<compile_context>
chip_gen: v7x
topology: tpu7x:2x2x1
jax: 0.10.0
libtpu: 0.0.40
codegen_flags: <defaults>
</compile_context>

<pallas_src>
import functools

import jax
import jax.numpy as jnp
from jax import lax
from jax.experimental import pallas as pl
from jax.experimental.pallas import tpu as pltpu


_NEG_BIG = -1e30  # finite "-inf" so 0 * _NEG_BIG == 0 (no NaN leaking from masked lanes)


def _round_up(x, m):
    return ((x + m - 1) // m) * m


def _row_valid_mask(p, i, tile_n, tiles_per_split, num_rows):
    """(tile_n, 1) bool mask: True for rows that really exist in the input."""
    row = (p * tiles_per_split + i) * tile_n + lax.broadcasted_iota(
        jnp.int32, (tile_n, 1), 0)
    return row < num_rows


def _soft_target_kernel(x_ref, t_ref, o_ref, m_sc, l_sc, st_sc, d_sc, *,
                        label_smoothing, num_rows, num_classes, tile_n, tile_c,
                        tiles_per_split):
    p = pl.program_id(0)
    i = pl.program_id(1)
    cc = pl.program_id(2)
    last_cc = pl.num_programs(2) - 1

    @pl.when(jnp.logical_and(i == 0, cc == 0))
    def _init_out():
        o_ref[...] = jnp.zeros_like(o_ref)

    @pl.when(cc == 0)
    def _init_state():
        m_sc[...] = jnp.full_like(m_sc, _NEG_BIG)
        l_sc[...] = jnp.zeros_like(l_sc)
        st_sc[...] = jnp.zeros_like(st_sc)
        d_sc[...] = jnp.zeros_like(d_sc)

    x = x_ref[...].astype(jnp.float32)            # (tile_n, tile_c) logits chunk
    t = t_ref[...].astype(jnp.float32)            # (tile_n, tile_c) soft targets chunk

    if label_smoothing > 0.0:                     # module semantics: t*(1-s/C) + s/C
        s_by_c = label_smoothing / num_classes
        t = t * (1.0 - s_by_c) + s_by_c

    if num_classes % tile_c != 0:                 # mask padded tail of the last chunk
        col = cc * tile_c + lax.broadcasted_iota(jnp.int32, (tile_n, tile_c), 1)
        col_ok = col < num_classes
        x = jnp.where(col_ok, x, _NEG_BIG)
        t = jnp.where(col_ok, t, 0.0)

    # Online (chunked) logsumexp + target dot, fused into one sweep per chunk.
    m_prev = m_sc[...]
    m_new = jnp.maximum(m_prev, jnp.max(x, axis=1, keepdims=True))
    shifted = x - m_new
    alpha = jnp.exp(m_prev - m_new)
    st_prev = st_sc[...]
    l_sc[...] = alpha * l_sc[...] + jnp.sum(jnp.exp(shifted), axis=1, keepdims=True)
    d_sc[...] = (d_sc[...] + (m_prev - m_new) * st_prev
                 + jnp.sum(t * shifted, axis=1, keepdims=True))
    st_sc[...] = st_prev + jnp.sum(t, axis=1, keepdims=True)
    m_sc[...] = m_new

    @pl.when(cc == last_cc)
    def _finalize():
        # loss_row = logsumexp*sum(t) - sum(t*x) = log(l)*sum(t) - sum(t*(x - m))
        per_row = jnp.log(l_sc[...]) * st_sc[...] - d_sc[...]
        valid = _row_valid_mask(p, i, tile_n, tiles_per_split, num_rows)
        o_ref[...] += jnp.sum(jnp.where(valid, per_row, 0.0))


def _hard_label_kernel(x_ref, lbl_ref, o_ref, m_sc, l_sc, selx_sc, sumx_sc, *,
                       label_smoothing, num_rows, num_classes, tile_n, tile_c,
                       tiles_per_split):
    p = pl.program_id(0)
    i = pl.program_id(1)
    cc = pl.program_id(2)
    last_cc = pl.num_programs(2) - 1

    @pl.when(jnp.logical_and(i == 0, cc == 0))
    def _init_out():
        o_ref[...] = jnp.zeros_like(o_ref)

    @pl.when(cc == 0)
    def _init_state():
        m_sc[...] = jnp.full_like(m_sc, _NEG_BIG)
        l_sc[...] = jnp.zeros_like(l_sc)
        selx_sc[...] = jnp.zeros_like(selx_sc)
        sumx_sc[...] = jnp.zeros_like(sumx_sc)

    x = x_ref[...].astype(jnp.float32)            # (tile_n, tile_c) logits chunk
    lbl = lbl_ref[...]                            # (tile_n, 1) int32 labels

    col = cc * tile_c + lax.broadcasted_iota(jnp.int32, (tile_n, tile_c), 1)
    mask_tail = (num_classes % tile_c) != 0
    x_m = jnp.where(col < num_classes, x, _NEG_BIG) if mask_tail else x

    # Online (chunked) logsumexp.
    m_prev = m_sc[...]
    m_new = jnp.maximum(m_prev, jnp.max(x_m, axis=1, keepdims=True))
    shifted = x_m - m_new
    alpha = jnp.exp(m_prev - m_new)
    l_sc[...] = alpha * l_sc[...] + jnp.sum(jnp.exp(shifted), axis=1, keepdims=True)
    # Logit at the label column, accumulated on raw x (max-shift applied at finalize).
    # Padded tail columns can never match a valid label, so no tail mask needed here.
    selx_sc[...] += jnp.sum(jnp.where(col == lbl, x, 0.0), axis=1, keepdims=True)
    if label_smoothing > 0.0:
        # Accumulate raw sum(x); derive sum(x - m) = sum_x - C*m at finalize
        # (removes the separate shifted-sum pass).
        x_z = jnp.where(col < num_classes, x, 0.0) if mask_tail else x
        sumx_sc[...] += jnp.sum(x_z, axis=1, keepdims=True)
    m_sc[...] = m_new

    @pl.when(cc == last_cc)
    def _finalize():
        m = m_sc[...]
        lse = jnp.log(l_sc[...])                  # logsumexp(x) - m
        sel = selx_sc[...] - m                    # shifted logit at the label
        if label_smoothing > 0.0:
            s_by_c = label_smoothing / num_classes
            sum_t = 1.0 - s_by_c + label_smoothing           # (1-s/C) + C*(s/C)
            t_dot = (1.0 - s_by_c) * sel + s_by_c * (sumx_sc[...] - num_classes * m)
        else:
            sum_t = 1.0
            t_dot = sel
        per_row = lse * sum_t - t_dot
        valid = _row_valid_mask(p, i, tile_n, tiles_per_split, num_rows)
        o_ref[...] += jnp.sum(jnp.where(valid, per_row, 0.0))


def smooth_cross_entropy_loss(logits, target, label_smoothing=0.0,
                              size_average=True, tile_n=None, tile_c=None):
    """Forward of SmoothCrossEntropyLoss.

    logits: (N, C) float array (any float dtype; streamed as-is, computed in f32).
    target: (N,) integer class labels OR (N, C) soft targets.
    Returns a scalar float32 loss.
    """
    n, c = logits.shape
    hard = (target.ndim == 1)

    logit_bytes = jnp.dtype(logits.dtype).itemsize
    if hard:
        labels = target.astype(jnp.int32).reshape(n, 1)
        tgt_elem_bytes = 0
        per_row_fixed = 2 * 128 * 4          # double-buffered (tile_n,1) label block (lane-padded)
    else:
        tgt_elem_bytes = jnp.dtype(target.dtype).itemsize
        per_row_fixed = 0
    per_row_fixed += 4 * 128 * 4             # four (tile_n,1) f32 state scratch buffers (lane-padded)

    # ---- generation-aware VMEM budget (v7x: 64 MiB physical, v5e/v6e: 128 MiB) ----
    try:
        vmem_cap = int(pltpu.get_tpu_info().vmem_capacity_bytes)
    except Exception:                         # conservative fallback
        vmem_cap = 64 * 1024 * 1024
    vmem_limit = min(int(0.82 * vmem_cap), 96 * 1024 * 1024)   # ~52 MiB v7x, 96 MiB v5e/v6e

    # Per-element VMEM cost: double-buffered input blocks PLUS ~4 live f32 intermediates
    # (x_f32 / shifted / exp / t*shifted) that the kernel body materializes per chunk.
    live_f32 = 4
    cost_per_elem = 2 * (logit_bytes + tgt_elem_bytes) + live_f32 * 4
    budget = int(0.85 * vmem_limit) - 2 * 1024 * 1024          # headroom for compiler scratch

    n_pad = _round_up(n, 8)

    # ---- class-chunk width: full rows if they fit, else multiples of 128 lanes ----
    if tile_c is None:
        rows_full = budget // (c * cost_per_elem + per_row_fixed)
        if rows_full >= min(128, n_pad):
            tile_c = c
        else:
            want_rows = min(512, n_pad)
            tile_c = (budget // want_rows - per_row_fixed) // cost_per_elem
    tile_c = int(tile_c)
    if tile_c >= c:
        tile_c = c
    else:
        tile_c = max(128, (tile_c // 128) * 128)
        if tile_c >= c:
            tile_c = c
    num_c_chunks = -(-c // tile_c)

    # ---- row-tile height: no artificial cap; the VMEM budget (incl. intermediates) decides ----
    if tile_n is None:
        tile_n = budget // (tile_c * cost_per_elem + per_row_fixed)
    tile_n = max(8, (min(int(tile_n), n_pad) // 8) * 8)

    tiles_total = -(-n // tile_n)
    num_splits = 2 if tiles_total >= 2 else 1      # 2 TensorCores on v7x; harmless elsewhere
    tiles_per_split = -(-tiles_total // num_splits)

    def row_c_block(p, i, cc):
        # Clamp so a padded trailing grid step never indexes a fully OOB block;
        # its rows are masked out inside the kernel.
        return (jnp.minimum(p * tiles_per_split + i, tiles_total - 1), cc)

    def row_block(p, i, cc):
        return (jnp.minimum(p * tiles_per_split + i, tiles_total - 1), 0)

    common = dict(label_smoothing=float(label_smoothing), num_rows=n, num_classes=c,
                  tile_n=tile_n, tile_c=tile_c, tiles_per_split=tiles_per_split)
    in_specs = [pl.BlockSpec((tile_n, tile_c), row_c_block)]
    if hard:
        in_specs.append(pl.BlockSpec((tile_n, 1), row_block))
        kernel = functools.partial(_hard_label_kernel, **common)
        operands = (logits, labels)
    else:
        in_specs.append(pl.BlockSpec((tile_n, tile_c), row_c_block))
        kernel = functools.partial(_soft_target_kernel, **common)
        operands = (logits, target)

    # One (8,128)-aligned lane-dense partial-sum slab per split, resident across the
    # row-tile and class-chunk reduction axes.
    out_specs = pl.BlockSpec((1, 8, 128), lambda p, i, cc: (p, 0, 0))
    out_shape = jax.ShapeDtypeStruct((num_splits, 8, 128), jnp.float32)

    tgt_bytes = n * (4 if hard else c * tgt_elem_bytes)
    cost = pl.CostEstimate(
        flops=8 * n * c,
        transcendentals=n * c + 2 * n * num_c_chunks,
        bytes_accessed=n * c * logit_bytes + tgt_bytes + num_splits * 8 * 128 * 4,
    )

    partials = pl.pallas_call(
        kernel,
        out_shape=out_shape,
        grid_spec=pltpu.PrefetchScalarGridSpec(
            num_scalar_prefetch=0,
            grid=(num_splits, tiles_per_split, num_c_chunks),
            in_specs=in_specs,
            out_specs=out_specs,
            scratch_shapes=[pltpu.VMEM((tile_n, 1), jnp.float32)] * 4,
        ),
        compiler_params=pltpu.CompilerParams(
            dimension_semantics=("parallel", "arbitrary", "arbitrary"),
            vmem_limit_bytes=vmem_limit,
        ),
        cost_estimate=cost,
    )(*operands)

    total = jnp.sum(partials[:, 0, 0])
    if size_average:
        total = total / jnp.float32(n)
    return total


def _reference(logits, target, label_smoothing=0.0, size_average=True):
    n, c = logits.shape
    if target.ndim == 1:
        target = jax.nn.one_hot(target, num_classes=c, dtype=jnp.float32)
    target = target.astype(jnp.float32)
    if label_smoothing > 0.0:
        s_by_c = label_smoothing / c
        target = target * (1.0 - s_by_c) + s_by_c
    logp = jax.nn.log_softmax(logits.astype(jnp.float32), axis=1)
    per_row = jnp.sum(-target * logp, axis=1)
    return jnp.mean(per_row) if size_average else jnp.sum(per_row)


if __name__ == "__main__":
    key = jax.random.PRNGKey(0)
    k1, k2, k3, k4, k5, k6, k7 = jax.random.split(key, 7)

    N, C = 20, 32
    logits = jax.random.normal(k1, (N, C), dtype=jnp.float32)
    labels = jax.random.randint(k2, (N,), 0, C)
    soft = jax.nn.softmax(jax.random.normal(k3, (N, C), dtype=jnp.float32), axis=1)

    # 1) Hard labels + smoothing, mean; forced 8-row tiles exercise the multi-tile grid,
    #    the 2-way core split, the clamped trailing block and the partial-row mask.
    loss1 = smooth_cross_entropy_loss(logits, labels, 0.1, True, tile_n=8)
    ref1 = _reference(logits, labels, 0.1, True)

    # 2) Soft bf16 targets + bf16 logits streamed as-is, sum reduction.
    loss2 = smooth_cross_entropy_loss(logits.astype(jnp.bfloat16),
                                      soft.astype(jnp.bfloat16), 0.0, False, tile_n=8)
    ref2 = _reference(logits.astype(jnp.bfloat16), soft.astype(jnp.bfloat16), 0.0, False)

    # 3) Hard labels, no smoothing, fully auto tiling (single-block path).
    loss3 = smooth_cross_entropy_loss(logits, labels, 0.0, True)
    ref3 = _reference(logits, labels, 0.0, True)

    # 4) Soft f32 targets + smoothing, mean, auto tiling.
    loss4 = smooth_cross_entropy_loss(logits, soft, 0.2, True)
    ref4 = _reference(logits, soft, 0.2, True)

    # 5) Forced class chunking (C=384 -> three 128-wide chunks): online-logsumexp path.
    N5, C5 = 16, 384
    logits5 = jax.random.normal(k4, (N5, C5), dtype=jnp.float32) * 3.0
    labels5 = jax.random.randint(k5, (N5,), 0, C5)
    loss5 = smooth_cross_entropy_loss(logits5, labels5, 0.1, True, tile_n=8, tile_c=128)
    ref5 = _reference(logits5, labels5, 0.1, True)

    # 6) Forced class chunking with a ragged last chunk (C=200 % 128 != 0): tail masking,
    #    both hard-label and soft-target kernels.
    N6, C6 = 16, 200
    logits6 = jax.random.normal(k6, (N6, C6), dtype=jnp.float32) * 2.0
    labels6 = jax.random.randint(k7, (N6,), 0, C6)
    soft6 = jax.nn.softmax(logits6 * 0.5, axis=1)
    loss6h = smooth_cross_entropy_loss(logits6, labels6, 0.05, False, tile_n=8, tile_c=128)
    ref6h = _reference(logits6, labels6, 0.05, False)
    loss6s = smooth_cross_entropy_loss(logits6, soft6, 0.1, True, tile_n=8, tile_c=128)
    ref6s = _reference(logits6, soft6, 0.1, True)

    jax.block_until_ready((loss1, loss2, loss3, loss4, loss5, loss6h, loss6s))

    assert jnp.allclose(loss1, ref1, rtol=1e-5, atol=1e-4), (loss1, ref1)
    assert jnp.allclose(loss2, ref2, rtol=1e-4, atol=1e-3), (loss2, ref2)
    assert jnp.allclose(loss3, ref3, rtol=1e-5, atol=1e-4), (loss3, ref3)
    assert jnp.allclose(loss4, ref4, rtol=1e-5, atol=1e-4), (loss4, ref4)
    assert jnp.allclose(loss5, ref5, rtol=1e-5, atol=1e-4), (loss5, ref5)
    assert jnp.allclose(loss6h, ref6h, rtol=1e-5, atol=1e-4), (loss6h, ref6h)
    assert jnp.allclose(loss6s, ref6s, rtol=1e-5, atol=1e-4), (loss6s, ref6s)

    print("KERNEL_OK")
</pallas_src>

<mosaic_0001>
module attributes {stable_mosaic.version = 11 : i64} {
  func.func @_hard_label_kernel(%arg0: i32, %arg1: i32, %arg2: i32, %arg3: memref<8x32xf32, #tpu.memory_space<vmem>>, %arg4: memref<8x1xi32, #tpu.memory_space<vmem>>, %arg5: memref<1x8x128xf32, #tpu.memory_space<vmem>>, %arg6: memref<8x1xf32, #tpu.memory_space<vmem>>, %arg7: memref<8x1xf32, #tpu.memory_space<vmem>>, %arg8: memref<8x1xf32, #tpu.memory_space<vmem>>, %arg9: memref<8x1xf32, #tpu.memory_space<vmem>>) attributes {dimension_semantics = [#tpu.dimension_semantics<parallel>, #tpu.dimension_semantics<arbitrary>, #tpu.dimension_semantics<arbitrary>], iteration_bounds = array<i64: 2, 2, 1>, scalar_prefetch = 0 : i64, scratch_operands = 4 : i64, tpu.core_type = #tpu.core_type<tc>, window_params = [{transform_indices = @transform_0, window_bounds = array<i64: 8, 32>}, {transform_indices = @transform_1, window_bounds = array<i64: 8, 1>}, {transform_indices = @transform_2, window_bounds = array<i64: 1, 8, 128>}]} {
    %c0_i32 = arith.constant 0 : i32
    %0 = arith.cmpi eq, %arg1, %c0_i32 : i32
    %c0_i32_0 = arith.constant 0 : i32
    %1 = arith.cmpi eq, %arg2, %c0_i32_0 : i32
    %2 = arith.andi %0, %1 : i1
    %3 = arith.extui %2 : i1 to i32
    %c0_i32_1 = arith.constant 0 : i32
    %4 = arith.cmpi ne, %3, %c0_i32_1 : i32
    scf.if %4 {
      %cst_29 = arith.constant 0.000000e+00 : f32
      %47 = vector.broadcast %cst_29 : f32 to vector<1x8x128xf32>
      %c0_30 = arith.constant 0 : index
      %c0_31 = arith.constant 0 : index
      %c0_32 = arith.constant 0 : index
      %48 = vector.load %arg5[%c0_30, %c0_31, %c0_32] : memref<1x8x128xf32, #tpu.memory_space<vmem>>, vector<1x8x128xf32>
      tpu.vector_store %arg5[%c0_30, %c0_31, %c0_32], %47 {strides = array<i32>} : memref<1x8x128xf32, #tpu.memory_space<vmem>>, vector<1x8x128xf32>,
    } else {
    }
    %c0_i32_2 = arith.constant 0 : i32
    %5 = arith.cmpi eq, %arg2, %c0_i32_2 : i32
    %6 = arith.extui %5 : i1 to i32
    %c0_i32_3 = arith.constant 0 : i32
    %7 = arith.cmpi ne, %6, %c0_i32_3 : i32
    scf.if %7 {
      %cst_29 = arith.constant -1.000000e+30 : f32
      %47 = vector.broadcast %cst_29 : f32 to vector<8x1xf32>
      %c0_30 = arith.constant 0 : index
      %c0_31 = arith.constant 0 : index
      %48 = vector.load %arg6[%c0_30, %c0_31] : memref<8x1xf32, #tpu.memory_space<vmem>>, vector<8x1xf32>
      tpu.vector_store %arg6[%c0_30, %c0_31], %47 {strides = array<i32>} : memref<8x1xf32, #tpu.memory_space<vmem>>, vector<8x1xf32>,
      %cst_32 = arith.constant 0.000000e+00 : f32
      %49 = vector.broadcast %cst_32 : f32 to vector<8x1xf32>
      %c0_33 = arith.constant 0 : index
      %c0_34 = arith.constant 0 : index
      %50 = vector.load %arg7[%c0_33, %c0_34] : memref<8x1xf32, #tpu.memory_space<vmem>>, vector<8x1xf32>
      tpu.vector_store %arg7[%c0_33, %c0_34], %49 {strides = array<i32>} : memref<8x1xf32, #tpu.memory_space<vmem>>, vector<8x1xf32>,
      %cst_35 = arith.constant 0.000000e+00 : f32
      %51 = vector.broadcast %cst_35 : f32 to vector<8x1xf32>
      %c0_36 = arith.constant 0 : index
      %c0_37 = arith.constant 0 : index
      %52 = vector.load %arg8[%c0_36, %c0_37] : memref<8x1xf32, #tpu.memory_space<vmem>>, vector<8x1xf32>
      tpu.vector_store %arg8[%c0_36, %c0_37], %51 {strides = array<i32>} : memref<8x1xf32, #tpu.memory_space<vmem>>, vector<8x1xf32>,
      %cst_38 = arith.constant 0.000000e+00 : f32
      %53 = vector.broadcast %cst_38 : f32 to vector<8x1xf32>
      %c0_39 = arith.constant 0 : index
      %c0_40 = arith.constant 0 : index
      %54 = vector.load %arg9[%c0_39, %c0_40] : memref<8x1xf32, #tpu.memory_space<vmem>>, vector<8x1xf32>
      tpu.vector_store %arg9[%c0_39, %c0_40], %53 {strides = array<i32>} : memref<8x1xf32, #tpu.memory_space<vmem>>, vector<8x1xf32>,
    } else {
    }
    %c0 = arith.constant 0 : index
    %c0_4 = arith.constant 0 : index
    %8 = vector.load %arg3[%c0, %c0_4] : memref<8x32xf32, #tpu.memory_space<vmem>>, vector<8x32xf32>
    %c0_5 = arith.constant 0 : index
    %c0_6 = arith.constant 0 : index
    %9 = vector.load %arg4[%c0_5, %c0_6] : memref<8x1xi32, #tpu.memory_space<vmem>>, vector<8x1xi32>
    %c32_i32 = arith.constant 32 : i32
    %10 = arith.muli %arg2, %c32_i32 : i32
    %11 = tpu.iota {dimensions = array<i32: 1>} : vector<8x32xi32>
    %12 = vector.broadcast %10 : i32 to vector<8x32xi32>
    %13 = arith.addi %12, %11 : vector<8x32xi32>
    %c0_7 = arith.constant 0 : index
    %c0_8 = arith.constant 0 : index
    %14 = vector.load %arg6[%c0_7, %c0_8] : memref<8x1xf32, #tpu.memory_space<vmem>>, vector<8x1xf32>
    %cst = arith.constant dense<0xFF800000> : vector<8xf32>
    %15 = vector.multi_reduction <maximumf>, %8, %cst [1] : vector<8x32xf32> to vector<8xf32>
    %16 = vector.shape_cast %15 : vector<8xf32> to vector<8x1xf32>
    %17 = arith.maximumf %14, %16 : vector<8x1xf32>
    %18 = vector.broadcast %17 : vector<8x1xf32> to vector<8x32xf32>
    %19 = arith.subf %8, %18 : vector<8x32xf32>
    %20 = arith.subf %14, %17 : vector<8x1xf32>
    %21 = math.exp %20 : vector<8x1xf32>
    %c0_9 = arith.constant 0 : index
    %c0_10 = arith.constant 0 : index
    %22 = vector.load %arg7[%c0_9, %c0_10] : memref<8x1xf32, #tpu.memory_space<vmem>>, vector<8x1xf32>
    %23 = arith.mulf %21, %22 : vector<8x1xf32>
    %24 = math.exp %19 : vector<8x32xf32>
    %cst_11 = arith.constant dense<0.000000e+00> : vector<8xf32>
    %25 = vector.multi_reduction <add>, %24, %cst_11 [1] : vector<8x32xf32> to vector<8xf32>
    %26 = vector.shape_cast %25 : vector<8xf32> to vector<8x1xf32>
    %27 = arith.addf %23, %26 : vector<8x1xf32>
    %c0_12 = arith.constant 0 : index
    %c0_13 = arith.constant 0 : index
    %28 = vector.load %arg7[%c0_12, %c0_13] : memref<8x1xf32, #tpu.memory_space<vmem>>, vector<8x1xf32>
    tpu.vector_store %arg7[%c0_12, %c0_13], %27 {strides = array<i32>} : memref<8x1xf32, #tpu.memory_space<vmem>>, vector<8x1xf32>,
    %c0_14 = arith.constant 0 : index
    %c0_15 = arith.constant 0 : index
    %29 = vector.load %arg8[%c0_14, %c0_15] : memref<8x1xf32, #tpu.memory_space<vmem>>, vector<8x1xf32>
    %30 = vector.broadcast %9 : vector<8x1xi32> to vector<8x32xi32>
    %31 = arith.cmpi eq, %13, %30 : vector<8x32xi32>
    %cst_16 = arith.constant 0.000000e+00 : f32
    %32 = vector.broadcast %cst_16 : f32 to vector<8x32xf32>
    %33 = arith.select %31, %8, %32 : vector<8x32xi1>, vector<8x32xf32>
    %cst_17 = arith.constant dense<0.000000e+00> : vector<8xf32>
    %34 = vector.multi_reduction <add>, %33, %cst_17 [1] : vector<8x32xf32> to vector<8xf32>
    %35 = vector.shape_cast %34 : vector<8xf32> to vector<8x1xf32>
    %36 = arith.addf %29, %35 : vector<8x1xf32>
    %c0_18 = arith.constant 0 : index
    %c0_19 = arith.constant 0 : index
    %37 = vector.load %arg8[%c0_18, %c0_19] : memref<8x1xf32, #tpu.memory_space<vmem>>, vector<8x1xf32>
    tpu.vector_store %arg8[%c0_18, %c0_19], %36 {strides = array<i32>} : memref<8x1xf32, #tpu.memory_space<vmem>>, vector<8x1xf32>,
    %c0_20 = arith.constant 0 : index
    %c0_21 = arith.constant 0 : index
    %38 = vector.load %arg9[%c0_20, %c0_21] : memref<8x1xf32, #tpu.memory_space<vmem>>, vector<8x1xf32>
    %cst_22 = arith.constant dense<0.000000e+00> : vector<8xf32>
    %39 = vector.multi_reduction <add>, %8, %cst_22 [1] : vector<8x32xf32> to vector<8xf32>
    %40 = vector.shape_cast %39 : vector<8xf32> to vector<8x1xf32>
    %41 = arith.addf %38, %40 : vector<8x1xf32>
    %c0_23 = arith.constant 0 : index
    %c0_24 = arith.constant 0 : index
    %42 = vector.load %arg9[%c0_23, %c0_24] : memref<8x1xf32, #tpu.memory_space<vmem>>, vector<8x1xf32>
    tpu.vector_store %arg9[%c0_23, %c0_24], %41 {strides = array<i32>} : memref<8x1xf32, #tpu.memory_space<vmem>>, vector<8x1xf32>,
    %c0_25 = arith.constant 0 : index
    %c0_26 = arith.constant 0 : index
    %43 = vector.load %arg6[%c0_25, %c0_26] : memref<8x1xf32, #tpu.memory_space<vmem>>, vector<8x1xf32>
    tpu.vector_store %arg6[%c0_25, %c0_26], %17 {strides = array<i32>} : memref<8x1xf32, #tpu.memory_space<vmem>>, vector<8x1xf32>,
    %c0_i32_27 = arith.constant 0 : i32
    %44 = arith.cmpi eq, %arg2, %c0_i32_27 : i32
    %45 = arith.extui %44 : i1 to i32
    %c0_i32_28 = arith.constant 0 : i32
    %46 = arith.cmpi ne, %45, %c0_i32_28 : i32
    scf.if %46 {
      %c0_29 = arith.constant 0 : index
      %c0_30 = arith.constant 0 : index
      %47 = vector.load %arg6[%c0_29, %c0_30] : memref<8x1xf32, #tpu.memory_space<vmem>>, vector<8x1xf32>
      %c0_31 = arith.constant 0 : index
      %c0_32 = arith.constant 0 : index
      %48 = vector.load %arg7[%c0_31, %c0_32] : memref<8x1xf32, #tpu.memory_space<vmem>>, vector<8x1xf32>
      %49 = math.log %48 : vector<8x1xf32>
      %c0_33 = arith.constant 0 : index
      %c0_34 = arith.constant 0 : index
      %50 = vector.load %arg8[%c0_33, %c0_34] : memref<8x1xf32, #tpu.memory_space<vmem>>, vector<8x1xf32>
      %51 = arith.subf %50, %47 : vector<8x1xf32>
      %cst_35 = arith.constant 0.996874988 : f32
      %52 = vector.broadcast %cst_35 : f32 to vector<8x1xf32>
      %53 = arith.mulf %52, %51 : vector<8x1xf32>
      %c0_36 = arith.constant 0 : index
      %c0_37 = arith.constant 0 : index
      %54 = vector.load %arg9[%c0_36, %c0_37] : memref<8x1xf32, #tpu.memory_space<vmem>>, vector<8x1xf32>
      %cst_38 = arith.constant 3.200000e+01 : f32
      %55 = vector.broadcast %cst_38 : f32 to vector<8x1xf32>
      %56 = arith.mulf %55, %47 : vector<8x1xf32>
      %57 = arith.subf %54, %56 : vector<8x1xf32>
      %cst_39 = arith.constant 3.125000e-03 : f32
      %58 = vector.broadcast %cst_39 : f32 to vector<8x1xf32>
      %59 = arith.mulf %58, %57 : vector<8x1xf32>
      %60 = arith.addf %53, %59 : vector<8x1xf32>
      %cst_40 = arith.constant 1.09687495 : f32
      %61 = vector.broadcast %cst_40 : f32 to vector<8x1xf32>
      %62 = arith.mulf %49, %61 : vector<8x1xf32>
      %63 = arith.subf %62, %60 : vector<8x1xf32>
      %c2_i32 = arith.constant 2 : i32
      %64 = arith.muli %arg0, %c2_i32 : i32
      %65 = arith.addi %64, %arg1 : i32
      %c8_i32 = arith.constant 8 : i32
      %66 = arith.muli %65, %c8_i32 : i32
      %67 = tpu.iota {dimensions = array<i32: 0>} : vector<8x1xi32>
      %68 = vector.broadcast %66 : i32 to vector<8x1xi32>
      %69 = arith.addi %68, %67 : vector<8x1xi32>
      %c20_i32 = arith.constant 20 : i32
      %70 = vector.broadcast %c20_i32 : i32 to vector<8x1xi32>
      %71 = arith.cmpi slt, %69, %70 : vector<8x1xi32>
      %c0_41 = arith.constant 0 : index
      %c0_42 = arith.constant 0 : index
      %c0_43 = arith.constant 0 : index
      %72 = vector.load %arg5[%c0_41, %c0_42, %c0_43] : memref<1x8x128xf32, #tpu.memory_space<vmem>>, vector<1x8x128xf32>
      %cst_44 = arith.constant 0.000000e+00 : f32
      %73 = vector.broadcast %cst_44 : f32 to vector<8x1xf32>
      %74 = arith.select %71, %63, %73 : vector<8x1xi1>, vector<8x1xf32>
      %75 = vector.shape_cast %74 : vector<8x1xf32> to vector<1x8x1xf32>
      %cst_45 = arith.constant dense<0.000000e+00> : vector<1xf32>
      %76 = vector.multi_reduction <add>, %75, %cst_45 [1, 2] : vector<1x8x1xf32> to vector<1xf32>
      %77 = vector.shape_cast %76 : vector<1xf32> to vector<1x1x1xf32>
      %78 = vector.extract %77[0, 0, 0] : f32 from vector<1x1x1xf32>
      %79 = vector.broadcast %78 : f32 to vector<1x8x128xf32>
      %80 = arith.addf %72, %79 : vector<1x8x128xf32>
      %c0_46 = arith.constant 0 : index
      %c0_47 = arith.constant 0 : index
      %c0_48 = arith.constant 0 : index
      %81 = vector.load %arg5[%c0_46, %c0_47, %c0_48] : memref<1x8x128xf32, #tpu.memory_space<vmem>>, vector<1x8x128xf32>
      tpu.vector_store %arg5[%c0_46, %c0_47, %c0_48], %80 {strides = array<i32>} : memref<1x8x128xf32, #tpu.memory_space<vmem>>, vector<1x8x128xf32>,
    } else {
    }
    return
  }
  func.func @transform_0(%arg0: i32, %arg1: i32, %arg2: i32) -> (i32, i32) {
    %c2_i32 = arith.constant 2 : i32
    %0 = arith.muli %arg0, %c2_i32 : i32
    %1 = arith.addi %0, %arg1 : i32
    %c2_i32_0 = arith.constant 2 : i32
    %2 = arith.minsi %1, %c2_i32_0 : i32
    %c0_i32 = arith.constant 0 : i32
    return %2, %arg2 : i32, i32
  }
  func.func @transform_1(%arg0: i32, %arg1: i32, %arg2: i32) -> (i32, i32) {
    %c2_i32 = arith.constant 2 : i32
    %0 = arith.muli %arg0, %c2_i32 : i32
    %1 = arith.addi %0, %arg1 : i32
    %c2_i32_0 = arith.constant 2 : i32
    %2 = arith.minsi %1, %c2_i32_0 : i32
    %c0_i32 = arith.constant 0 : i32
    %c0_i32_1 = arith.constant 0 : i32
    return %2, %c0_i32 : i32, i32
  }
  func.func @transform_2(%arg0: i32, %arg1: i32, %arg2: i32) -> (i32, i32, i32) {
    %c0_i32 = arith.constant 0 : i32
    %c0_i32_0 = arith.constant 0 : i32
    %c0_i32_1 = arith.constant 0 : i32
    return %arg0, %c0_i32, %c0_i32_0 : i32, i32, i32
  }
}

</mosaic_0001>

<bundles_post_ra>
// kernel: tpu_custom_call.1
= control target key start
LH: loop header
LB: loop body
LE: loop exit
PB: predicated region body
PF: predicated region fallthrough
CT: control target
= control target key end

     0   :  { %7 = vsyncpa [#allocation7], 0  ;;  %s842_s0 = inlined_call_operand.vmem [shape: f32[20,32], index: 0, kind: input, shape index: {}]   ;;  %s843_s1 = inlined_call_operand.vmem [shape: s32[20,1], index: 1, kind: input, shape index: {}]   ;;  %s844_s2 = inlined_call_operand.hbm [shape: f32[2,8,128], index: 2, kind: output, shape index: {}]  }
   0x1   :  { %9 = vsyncpa [#allocation7 + $0x1], 0  ;;  %s678_s9 = smov 0   ;;  %s680_s10 = smov 0  }
   0x2   :  { %s682_s11 = smov 0   ;;  %s684_s12 = smov 0  }
   0x3   :  { %s686_s13 = smov 0   ;;  %s688_s14 = smov 0  }
   0x4   :  { %s690_s15 = smov 0   ;;  %s692_s16 = smov 0  }
   0x5 LB: > { %s449_s17 = sadd.s32 4294967295, %s656_s16   ;;  %s450_s18 = sadd.s32 4294967294, %s656_s16   ;;  %s656_s16 = sphi %s692_s16, %s15_s16   ;;  %s652_s15 = sphi %s690_s15, %s853_s15   ;;  %s648_s14 = sphi %s688_s14, %s852_s14   ;;  %s644_s13 = sphi %s686_s13, %s851_s13   ;;  %s640_s12 = sphi %s684_s12, %s850_s12   ;;  %s636_s11 = sphi %s682_s11, %s849_s11   ;;  %s632_s10 = sphi %s680_s10, %s848_s10   ;;  %s628_s9 = sphi %s678_s9, %s847_s9  }
   0x6   : > { %s30_s19 = sadd.s32 1, %s648_s14  ;;  %s34_s20 = sadd.s32 1, %s652_s15 }
   0x7   : > { %p32_p0 = scmp.ge.s32.totalorder %s30_s19, 2  ;;  %p121_p1 = scmp.ne.s32.totalorder %s636_s11, %s632_s10 }
   0x8   : > { %p122_p2 = scmp.eq.s32.totalorder %s449_s17, 3  ;;  %p127_p4 = scmp.ne.s32.totalorder %s632_s10, %s628_s9 }
   0x9   : > { %s855_s19 = smov (%p32_p0, %s30_s19), 0  ;;  %s857_s20 = smov (!%p32_p0, %s34_s20), %s652_s15 }
   0xa   : > { %p727_p3 = por %p122_p2, %p121_p1  ;;  %p36_p5 = scmp.ge.s32.totalorder %s857_s20, 2 }
   0xb   : > { %p128_p6 = scmp.eq.s32.totalorder %s450_s18, 3  ;;  %p457_p7 = scmp.ge.s32.totalorder %s656_s16, 1 }
   0xc   : > { %p179_p8 = scmp.lt.s32.totalorder %s656_s16, 5  ;;  %s859_s20 = smov (%p36_p5, %s857_s20), 0 }
   0xd   : > { %p737_p9 = por %p128_p6, %p127_p4  ;;  %s108_s23 = ssub.s32 %s652_s15, %s859_s20 }
   0xe   : > { %p180_p10 = pnand %p457_p7, %p179_p8  ;;  %s111_s24 = sadd.s32 1, %s636_s11 }
   0xf   : > { %p109_p11 = scmp.eq.s32.totalorder %s108_s23, 0  ;;  %s212_s26 = sand.u32 (!%p180_p10), 1, %s632_s10  }
  0x10   : > { %183 = sbr.rel (%p180_p10) target bundleno = 713 (0x2c9), region = 28  ;;  %s459_s27 = sshll.u32 (!%p180_p10), %s644_s13, 1 }
  0x11   : > { %s745_s25 = scalar_select %p109_p11, %s636_s11, %s111_s24  }
  0x12   : > { %s458_s28 = sshll.u32 (!%p180_p10), %s212_s26, 3  ;;  %s752_s29 = sadd.s32 (!%p180_p10), %s640_s12, %s459_s27 }
  0x13   : > { %p217_p12 = scmp.lt.s32.totalorder (!%p180_p10), %s752_s29, 2  ;;  %p242_p13 = scmp.eq.s32.totalorder (!%p180_p10), %s640_s12, 0 }
  0x14   : > { %s763_s18 = scalar_lea.vmem (!%p180_p10), [#allocation6], %s458_s28 }
  0x17   : > { %s218_s30 = scalar_select %p217_p12, %s752_s29, 2 }
  0x18   : > { %247 = sbr.rel (!%p242_p13) target bundleno = 31 (0x1f), region = 32  ;;  %v658_v0 = vmov (%p242_p13), 0.0  }
  0x19   : > { %s861_s30 = smov (!%p217_p12, %s218_s30), 2  ;;  %248 = vst [vmem:[%s763_s18] sm:$0xff] (%p242_p13), %v658_v0 }
  0x1a   : > { %s463_s3 = sshll.u32 %s861_s30, 3 }
  0x1b   : > { %s225_s6 = scalar_lea.vmem %s842_s0, %s463_s3  ;;  %s237_s17 = scalar_lea.vmem %s843_s1, %s463_s3 }
  0x1f PF: > { %v257_v1 = vld [vmem:[%s225_s6] sm:$0xff]  ;;  %vm265_vm0 = vcmask 261120   ;;  %vm252_vm1 = vcmask 7168   ;;  %v659_v3 = vmov -1e+30   ;;  %v660_v4 = vmov 0  }
  0x20   : > { %v266_v2 = vsel %vm265_vm0, %v257_v1, -inf  ;;  %253 = vst.msk [vmem:[#allocation2] sm:$0xff] %vm252_vm1, %v659_v3  ;;  %554 = vset.pattern.permute.xlu0 %v660_v4  ;;  %555 = vset.pattern.permute.xlu1 %v660_v4  ;;  %v258_v5 = vld [vmem:[%s237_s17] sm:$0xff]  ;;  %v661_v6 = vmov 0.0   ;;  %v260_v14 = vlaneseq  ;;  %v301_v21 = vsel %vm265_vm0, %v257_v1, 0.0  ;;  %s471_s12 = sshll.u32 %s752_s29, 3 }
  0x21   : > { %267 = vmax.xlane.f32.xlu0 %v266_v2  ;;  %291 = vperm.xlu1 %555, %v258_v5   ;;  %254 = vst.msk [vmem:[#allocation3] sm:$0xff] %vm252_vm1, %v661_v6  ;;  %255 = vst.msk [vmem:[#allocation4] sm:$0xff] %vm252_vm1, %v661_v6  ;;  %v329_v41 = vstv %s471_s12  ;;  %v332_v60 = vld [vmem:[%s763_s18] sm:$0xff]  ;;  %s473_s23 = sshll.u32 %s644_s13, 7  ;;  %s361_s24 = sshll.u32 %s763_s18, 4  ;;  %s788_s24 = int_to_ptr.vmem [resolvable:$true] %s361_s24 }
  0x22   : > { %256 = vst.msk [vmem:[#allocation5] sm:$0xff] %vm252_vm1, %v661_v6  ;;  %v261_v15 = vand.u32 127, %v260_v14  ;;  %v328_v39 = vshrl.u32 %v260_v14, 7  ;;  %s786_s30 = scalar_lea.hbm %s844_s2, %s473_s23  ;;  %s348_s3 = scalar_lea.sflag [#allocation7], %s212_s26 }
  0x23   : > { %s562_s4 = scalar_lea.vmem %s788_s24, 128  ;;  %s662_s13 = smov [#allocation6]  }
  0x24   : > { %v330_v46 = vadd.s32 %v329_v41, %v328_v39  ;;  %p563_p0 = scmp.ne.s32.totalorder %s788_s24, %s562_s4  ;;  %s566_s5 = sshll.u32 %s662_s13, 4  ;;  %s567_s5 = int_to_ptr.vmem [resolvable:$false] %s566_s5 }
  0x25   : > { %s568_s6 = scalar_lea.vmem %s567_s5, 256  ;;  %p569_p4 = scmp.lt.s32.totalorder %s788_s24, %s567_s5 }
  0x26   : > { %vm331_vm3 = vcmp.lt.s32.totalorder %v330_v46, 20  ;;  %p564_p1 = pnand %p563_p0, %p727_p3  ;;  %p570_p5 = scmp.lt.s32.totalorder %s568_s6, %s562_s4 }
  0x27   : > { %v264_v7 = vld [vmem:[#allocation2] sm:$0xff] }
  0x28   : > { %v279_v24 = vld [vmem:[#allocation3] sm:$0xff]  ;;  %v289_v28 = vld [vmem:[#allocation4] sm:$0xff]  ;;  %p565_p2 = pneg %p564_p1  ;;  %p571_p6 = por %p570_p5, %p569_p4 }
  0x29   : > { %v300_v31 = vld [vmem:[#allocation5] sm:$0xff] }
  0x2a   : > { %p572_p7 = pnand %p571_p6, %p565_p2 }
  0xa0   : > { %v292_v16 = vpop.permute.xlu1 %291 }
  0xa1   : > { %vm293_vm2 = vcmp.eq.s32.totalorder %v261_v15, %v292_v16 }
  0xa2   : > { %v294_v18 = vsel %vm293_vm2, %v257_v1, 0.0 }
  0xa3   : > { %v295_v20 = vsel %vm265_vm0, %v294_v18, 0.0 }
  0xae   : > { %v268_v8 = vpop.xlane.xlu0 %267 }
  0xaf   : > { %v269_v9 = vmax.f32 %v264_v7, %v268_v8 }
  0xb1   : > { %v276_v10 = vsub.f32 %v264_v7, %v269_v9  ;;  %306 = vst.msk [vmem:[#allocation2] sm:$0xff] %vm252_vm1, %v269_v9  ;;  %272 = vperm.xlu0 %554, %v269_v9  }
  0xb3   : > { %v277_v22 = vmul.f32 1.442695, %v276_v10 }
  0xb8   : > { %v310_v35 = vld [vmem:[#allocation2] sm:$0xff] }
  0xb9   : > { %v318_v38 = vmul.f32 32.0, %v310_v35 }
 0x130   : > { %v273_v11 = vpop.permute.xlu0 %272 }
 0x131   : > { %v275_v12 = vsub.f32 %v257_v1, %v273_v11 }
 0x133   : > { %v281_v13 = vmul.f32 1.442695, %v275_v12 }
 0x135   : > { %556 = vpow2.f32 %v281_v13 }
 0x136   : > { %558 = vpow2.f32 %v277_v22 }
 0x13f   : > { %v557_v17 = vpop.eup %556 }
 0x140   : > { %v283_v19 = vsel %vm265_vm0, %v557_v17, 0.0  ;;  %v559_v23 = vpop.eup %558 }
 0x141   : > { %284 = vadd.xlane.f32.xlu1 %v283_v19  ;;  %v280_v25 = vmul.f32 %v559_v23, %v279_v24 }
 0x145   : > { %296 = vadd.xlane.f32.xlu1 %v295_v20 }
 0x149   : > { %302 = vadd.xlane.f32.xlu1 %v301_v21 }
 0x1ce   : > { %v285_v26 = vpop.xlane.xlu1 %284 }
 0x1cf   : > { %v286_v27 = vadd.f32 %v285_v26, %v280_v25 }
 0x1d1   : > { %288 = vst.msk [vmem:[#allocation3] sm:$0xff] %vm252_vm1, %v286_v27 }
 0x1d2   : > { %v297_v29 = vpop.xlane.xlu1 %296 }
 0x1d3   : > { %v298_v30 = vadd.f32 %v297_v29, %v289_v28 }
 0x1d5   : > { %299 = vst.msk [vmem:[#allocation4] sm:$0xff] %vm252_vm1, %v298_v30 }
 0x1d6   : > { %v303_v32 = vpop.xlane.xlu1 %302 }
 0x1d7   : > { %v304_v33 = vadd.f32 %v303_v32, %v300_v31 }
 0x1d8   : > { %v311_v34 = vld [vmem:[#allocation3] sm:$0xff] }
 0x1d9   : > { %305 = vst.msk [vmem:[#allocation5] sm:$0xff] %vm252_vm1, %v304_v33  ;;  %560 = vlog2.f32 %v311_v34 }
 0x1dc   : > { %v314_v36 = vld [vmem:[#allocation4] sm:$0xff] }
 0x1dd   : > { %v315_v37 = vsub.f32 %v314_v36, %v310_v35 }
 0x1df   : > { %v316_v44 = vmul.f32 0.996875, %v315_v37 }
 0x1e0   : > { %v317_v40 = vld [vmem:[#allocation5] sm:$0xff] }
 0x1e1   : > { %v319_v42 = vsub.f32 %v317_v40, %v318_v38 }
 0x1e3   : > { %v561_v43 = vpop.eup %560  ;;  %v320_v45 = vmul.f32 0.003125, %v319_v42 }
 0x1e4   : > { %v313_v47 = vmul.f32 0.6931472, %v561_v43 }
 0x1e5   : > { %v321_v48 = vadd.f32 %v320_v45, %v316_v44 }
 0x1e6   : > { %v322_v49 = vmul.f32 1.096875, %v313_v47 }
 0x1e8   : > { %v323_v50 = vsub.f32 %v322_v49, %v321_v48 }
 0x1ea   : > { %v333_v51 = vsel %vm331_vm3, %v323_v50, 0.0 }
 0x1eb   : > { %v334_v52 = vsel %vm252_vm1, %v333_v51, 0.0 }
 0x1ec   : > { %335 = vadd.xlane.f32.xlu0 %v334_v52 }
 0x279   : > { %v336_v53 = vpop.xlane.xlu0 %335 }
 0x27a   : > { %v337_v54 = vrot.slane %v336_v53, 4 }
 0x27c   : > { %v338_v55 = vadd.f32 %v337_v54, %v336_v53 }
 0x27e   : > { %v339_v56 = vrot.slane %v338_v55, 2 }
 0x280   : > { %v340_v57 = vadd.f32 %v339_v56, %v338_v55 }
 0x282   : > { %v341_v58 = vrot.slane %v340_v57, 1 }
 0x284   : > { %v342_v59 = vadd.f32 %v341_v58, %v340_v57 }
 0x286   : > { %477 = vpush %v342_v59 }
 0x2b7   : > { %s478_s27 = spop %477 }
 0x2b8   : > { %v344_v61 = vstv %s478_s27 }
 0x2b9   : > { %v345_v62 = vadd.f32 %v344_v61, %v332_v60 }
 0x2bb   : > { %346 = vst [vmem:[%s763_s18] sm:$0xff] %v345_v62 }
 0x2bc   : > { %575 = shalt.err (!%p572_p7)
}
 0x2bd   : > { %s576_s26 = scalar_lea.hbm %s786_s30, 128  ;;  %s580_s17 = scalar_lea.hbm %s844_s2, 256 }
 0x2be   : > { %p577_p8 = scmp.ne.s32.totalorder %s786_s30, %s576_s26  ;;  %p581_p12 = scmp.lt.u32.totalorder %s786_s30, %s844_s2 }
 0x2bf   : > { %p582_p13 = scmp.lt.u32.totalorder %s580_s17, %s576_s26  ;;  %p584_p1 = scmp.lt.u32.totalorder %s576_s26, %s786_s30 }
 0x2c0   : > { %p578_p10 = pnand %p577_p8, %p727_p3 }
 0x2c1   : > { %p583_p0 = por %p582_p13, %p581_p12 }
 0x2c2   : > { %p579_p11 = pneg %p578_p10 }
 0x2c3   : > { %p585_p2 = por %p584_p1, %p583_p0 }
 0x2c5   : > { %p586_p4 = pnand %p585_p2, %p579_p11 }
 0x2c7   : > { %589 = shalt.err (!%p586_p4)
}
 0x2c8   : > { %479 = dma.vmem_to_hbm [thread:$0]  (%p727_p3), %s788_s24, 128, %s786_s30, %s348_s3  }
 0x2c9 PF: > { %p485_p5 = scmp.ge.s32.totalorder %s656_s16, 2  ;;  %s373_s23 = sand.u32 1, %s628_s9  }
 0x2ca   : > { %s374_s27 = scalar_lea.sflag [#allocation7], %s373_s23 }
 0x2cb   : > { %p482_p6 = pnand %p485_p5, %p737_p9 }
 0x2cd   : > { %623 = dma.done.wait (!%p482_p6), %s374_s27, 128  }
 0x2ce   : > { %625 = vsyncadd (!%p482_p6), %s374_s27, 4294967168  ;;  %s15_s16 = sadd.s32 1, %s656_s16   ;;  %s847_s9 = smov %s632_s10 }
 0x2cf   : > { %p12_p7 = scmp.ge.s32.totalorder %s15_s16, 6   ;;  %s848_s10 = smov %s636_s11 }
 0x2d0   : > { %s849_s11 = smov %s745_s25  ;;  %s850_s12 = smov %s648_s14 }
 0x2d1   : > { %s851_s13 = smov %s652_s15  ;;  %s852_s14 = smov %s855_s19 }
 0x2d2   : > { %s853_s15 = smov %s859_s20  ;;  %14 = sbr.rel (!%p12_p7) target bundleno = 5 (0x5), region = 78 }
 0x2d9   :  { %379 = vsyncpa [#allocation7], 1 }
 0x2da   :  { %381 = vsyncpa [#allocation7 + $0x1], 1 }

</bundles_post_ra>
